<compile_context>
chip_gen: v6e
topology: v6e:2x2x1
jax: 0.10.0
libtpu: 0.0.40
codegen_flags: <defaults>
</compile_context>

<pallas_src>
from functools import partial

import jax
import jax.numpy as jnp
from jax import lax
from jax.experimental import pallas as pl
from jax.experimental.pallas import tpu as pltpu


_VMEM_LIMIT = 32 * 1024 * 1024  # bytes; well above this kernel's footprint, safe on all gens


# ----------------------------------------------------------------------------
# Shared cell math (operates on loaded VMEM values)
# ----------------------------------------------------------------------------
def _cell(obs, h, w1, b1, w_i, b_i, w_h, b_h, w2, b2):
    """One fused fc1 -> GRUCell -> fc2 step.

    Weights are bf16; activations are cast to bf16 only for the MXU dots,
    accumulation and all gating math stay float32.
    """
    f32 = jnp.float32
    wdt = w1.dtype                      # bfloat16 storage dtype
    H = h.shape[-1]

    # x = relu(fc1(obs))
    x = jnp.dot(obs.astype(wdt), w1, preferred_element_type=f32) + b1
    x = jnp.maximum(x, 0.0)

    # Fused gate matmuls: gi/gh are (B, 3H) lane-dense.
    #   b_i = [b_ir+b_hr | b_iz+b_hz | b_in],  b_h = [0 | 0 | b_hn]
    gi = jnp.dot(x.astype(wdt), w_i, preferred_element_type=f32) + b_i
    gh = jnp.dot(h.astype(wdt), w_h, preferred_element_type=f32) + b_h

    r = jax.nn.sigmoid(gi[:, 0 * H:1 * H] + gh[:, 0 * H:1 * H])
    z = jax.nn.sigmoid(gi[:, 1 * H:2 * H] + gh[:, 1 * H:2 * H])
    n = jnp.tanh(gi[:, 2 * H:3 * H] + r * gh[:, 2 * H:3 * H])
    h_new = (1.0 - z) * n + z * h

    # q = fc2(h_new)  (fc2 padded to a 128-lane-multiple output width)
    q = jnp.dot(h_new.astype(wdt), w2, preferred_element_type=f32) + b2
    return q, h_new


# ----------------------------------------------------------------------------
# Single-step kernel (matches the PyTorch module's forward signature)
# ----------------------------------------------------------------------------
def _rnn_cell_kernel(obs_ref, h_ref,
                     w1_ref, b1_ref, wi_ref, bi_ref, wh_ref, bh_ref,
                     w2_ref, b2_ref,
                     q_ref, h_out_ref):
    q, h_new = _cell(obs_ref[...], h_ref[...],
                     w1_ref[...], b1_ref[...],
                     wi_ref[...], bi_ref[...],
                     wh_ref[...], bh_ref[...],
                     w2_ref[...], b2_ref[...])
    q_ref[...] = q.astype(q_ref.dtype)
    h_out_ref[...] = h_new.astype(h_out_ref.dtype)


@partial(jax.jit, static_argnames=("rnn_hidden_dim", "n_actions"))
def rnn_forward(obs, hidden_state, packed, *, rnn_hidden_dim, n_actions):
    """obs: (B, input_shape); hidden_state: reshapable to (B, rnn_hidden_dim).

    NOTE: for repeated stepping prefer rnn_rollout — a single call leaves the
    weight DMA fully exposed (grid=(), no pipelining to hide it behind).
    """
    h_in = hidden_state.reshape(-1, rnn_hidden_dim).astype(jnp.float32)
    B = obs.shape[0]
    assert h_in.shape[0] == B, "hidden_state batch must match obs batch"
    a_pad = packed["w2"].shape[1]

    args = (obs, h_in,
            packed["w1"], packed["b1"],
            packed["W_i"], packed["b_i"],
            packed["W_h"], packed["b_h"],
            packed["w2"], packed["b2"])

    vmem = pl.BlockSpec(memory_space=pltpu.MemorySpace.VMEM)
    q_pad, h = pl.pallas_call(
        _rnn_cell_kernel,
        grid_spec=pl.GridSpec(
            grid=(),
            in_specs=[vmem] * len(args),
            out_specs=(vmem, vmem),
        ),
        out_shape=(
            jax.ShapeDtypeStruct((B, a_pad), jnp.float32),
            jax.ShapeDtypeStruct((B, rnn_hidden_dim), jnp.float32),
        ),
        # reuse the hidden-state buffer for the new hidden state
        input_output_aliases={1: 1},
        compiler_params=pltpu.CompilerParams(vmem_limit_bytes=_VMEM_LIMIT),
    )(*args)
    return q_pad[:, :n_actions], h


# ----------------------------------------------------------------------------
# Sequence kernel: single grid=() invocation, time loop inside the kernel.
# Weights + obs_seq resident in VMEM; hidden carried as a loop value.
# ----------------------------------------------------------------------------
def _rnn_rollout_kernel(obs_ref, h0_ref,
                        w1_ref, b1_ref, wi_ref, bi_ref, wh_ref, bh_ref,
                        w2_ref, b2_ref,
                        q_ref, h_final_ref):
    T = obs_ref.shape[0]

    # Hoist all weight/bias loads out of the time loop.
    w1, b1 = w1_ref[...], b1_ref[...]
    w_i, b_i = wi_ref[...], bi_ref[...]
    w_h, b_h = wh_ref[...], bh_ref[...]
    w2, b2 = w2_ref[...], b2_ref[...]

    def step(t, h):
        q, h_new = _cell(obs_ref[t], h, w1, b1, w_i, b_i, w_h, b_h, w2, b2)
        q_ref[t] = q.astype(q_ref.dtype)
        return h_new

    h_final = lax.fori_loop(0, T, step, h0_ref[...].astype(jnp.float32),
                            unroll=True)
    h_final_ref[...] = h_final.astype(h_final_ref.dtype)


@partial(jax.jit, static_argnames=("rnn_hidden_dim", "n_actions"))
def rnn_rollout(obs_seq, hidden_state, packed, *, rnn_hidden_dim, n_actions):
    """Apply the GRU cell over a whole sequence inside one kernel invocation.

    obs_seq: (T, B, input_shape); returns (q_seq (T,B,n_actions), h_final (B,H)).
    """
    T, B, _ = obs_seq.shape
    H = rnn_hidden_dim
    h0 = hidden_state.reshape(-1, H).astype(jnp.float32)
    assert h0.shape[0] == B
    a_pad = packed["w2"].shape[1]

    args = (obs_seq, h0,
            packed["w1"], packed["b1"],
            packed["W_i"], packed["b_i"],
            packed["W_h"], packed["b_h"],
            packed["w2"], packed["b2"])

    vmem = pl.BlockSpec(memory_space=pltpu.MemorySpace.VMEM)
    q_seq_pad, h_final = pl.pallas_call(
        _rnn_rollout_kernel,
        grid_spec=pl.GridSpec(
            grid=(),
            in_specs=[vmem] * len(args),
            out_specs=(vmem, vmem),
        ),
        out_shape=(
            jax.ShapeDtypeStruct((T, B, a_pad), jnp.float32),
            jax.ShapeDtypeStruct((B, H), jnp.float32),
        ),
        # reuse the initial-hidden buffer for the final hidden state
        input_output_aliases={1: 1},
        compiler_params=pltpu.CompilerParams(vmem_limit_bytes=_VMEM_LIMIT),
    )(*args)
    return q_seq_pad[:, :, :n_actions], h_final


# ----------------------------------------------------------------------------
# Parameter init (nn.Linear / nn.GRUCell style) + one-time packing
# ----------------------------------------------------------------------------
def init_params(key, input_shape, hidden, n_actions):
    ks = jax.random.split(key, 16)
    u = lambda k, shape, bound: jax.random.uniform(
        k, shape, jnp.float32, minval=-bound, maxval=bound)

    b_fc1 = 1.0 / jnp.sqrt(input_shape)
    b_gru = 1.0 / jnp.sqrt(hidden)

    return {
        # fc1: Linear(input_shape -> hidden), stored (in, out)
        "w1": u(ks[0], (input_shape, hidden), b_fc1),
        "b1": u(ks[1], (1, hidden), b_fc1),
        # GRUCell(hidden -> hidden): per-gate (in, out) weights, gate order r,z,n
        "w_ir": u(ks[2], (hidden, hidden), b_gru),
        "w_iz": u(ks[3], (hidden, hidden), b_gru),
        "w_in": u(ks[4], (hidden, hidden), b_gru),
        "w_hr": u(ks[5], (hidden, hidden), b_gru),
        "w_hz": u(ks[6], (hidden, hidden), b_gru),
        "w_hn": u(ks[7], (hidden, hidden), b_gru),
        "b_ir": u(ks[8], (1, hidden), b_gru),
        "b_iz": u(ks[9], (1, hidden), b_gru),
        "b_in": u(ks[10], (1, hidden), b_gru),
        "b_hr": u(ks[11], (1, hidden), b_gru),
        "b_hz": u(ks[12], (1, hidden), b_gru),
        "b_hn": u(ks[13], (1, hidden), b_gru),
        # fc2: Linear(hidden -> n_actions)
        "w2": u(ks[14], (hidden, n_actions), b_gru),
        "b2": u(ks[15], (1, n_actions), b_gru),
    }


def pack_params(p, weight_dtype=jnp.bfloat16):
    """One-time packing: fused gate weights, folded biases, lane-padded fc2.

    Weights stored in `weight_dtype` (bf16 halves weight DMA / resident VMEM);
    biases stay float32 (they feed the f32 gating path directly).
    """
    hidden = p["w_ir"].shape[0]
    n_actions = p["w2"].shape[1]
    a_pad = max(128, ((n_actions + 127) // 128) * 128)

    w_i = jnp.concatenate([p["w_ir"], p["w_iz"], p["w_in"]], axis=1)   # (H, 3H)
    w_h = jnp.concatenate([p["w_hr"], p["w_hz"], p["w_hn"]], axis=1)   # (H, 3H)
    # b_i = [b_ir+b_hr | b_iz+b_hz | b_in]; b_hn must stay on the hidden side
    b_i = jnp.concatenate(
        [p["b_ir"] + p["b_hr"], p["b_iz"] + p["b_hz"], p["b_in"]], axis=1)
    b_h = jnp.concatenate(
        [jnp.zeros((1, 2 * hidden), jnp.float32), p["b_hn"]], axis=1)

    w2 = jnp.pad(p["w2"], ((0, 0), (0, a_pad - n_actions)))
    b2 = jnp.pad(p["b2"], ((0, 0), (0, a_pad - n_actions)))

    return {
        "w1": p["w1"].astype(weight_dtype), "b1": p["b1"],
        "W_i": w_i.astype(weight_dtype), "b_i": b_i,
        "W_h": w_h.astype(weight_dtype), "b_h": b_h,
        "w2": w2.astype(weight_dtype), "b2": b2,
    }


# ----------------------------------------------------------------------------
# Pure-JAX references (float32, PyTorch semantics)
# ----------------------------------------------------------------------------
def rnn_forward_ref(obs, hidden_state, p, hidden):
    h = hidden_state.reshape(-1, hidden)
    x = jax.nn.relu(obs @ p["w1"] + p["b1"])
    r = jax.nn.sigmoid(x @ p["w_ir"] + p["b_ir"] + h @ p["w_hr"] + p["b_hr"])
    z = jax.nn.sigmoid(x @ p["w_iz"] + p["b_iz"] + h @ p["w_hz"] + p["b_hz"])
    n = jnp.tanh(x @ p["w_in"] + p["b_in"] + r * (h @ p["w_hn"] + p["b_hn"]))
    h_new = (1.0 - z) * n + z * h
    q = h_new @ p["w2"] + p["b2"]
    return q, h_new


def rnn_rollout_ref(obs_seq, hidden_state, p, hidden):
    def step(h, obs):
        q, h_new = rnn_forward_ref(obs, h, p, hidden)
        return h_new, q
    h_final, q_seq = jax.lax.scan(step, hidden_state.reshape(-1, hidden), obs_seq)
    return q_seq, h_final


# ----------------------------------------------------------------------------
if __name__ == "__main__":
    INPUT_SHAPE = 32     # obs feature dim
    RNN_HIDDEN = 128     # args.rnn_hidden_dim (128 -> lane-aligned gate slices)
    N_ACTIONS = 16       # args.n_actions
    BATCH = 32           # multiple of the 8-row sublane tile; scale further in real use
    SEQ = 8              # rollout length for the sequence kernel

    key = jax.random.PRNGKey(0)
    k_obs, k_seq, k_h, k_p = jax.random.split(key, 4)

    obs = jax.random.normal(k_obs, (BATCH, INPUT_SHAPE), jnp.float32)
    obs_seq = jax.random.normal(k_seq, (SEQ, BATCH, INPUT_SHAPE), jnp.float32)
    hidden_state = jax.random.normal(k_h, (BATCH, RNN_HIDDEN), jnp.float32)

    params = init_params(k_p, INPUT_SHAPE, RNN_HIDDEN, N_ACTIONS)
    packed = pack_params(params)

    # Tolerances account for bf16 weight storage (math/accumulation stay f32).
    ATOL = RTOL = 2e-2

    # --- single-step cell (matches PyTorch forward) ---
    q_ref, h_ref = rnn_forward_ref(obs, hidden_state, params, RNN_HIDDEN)
    q, h = rnn_forward(obs, hidden_state, packed,
                       rnn_hidden_dim=RNN_HIDDEN, n_actions=N_ACTIONS)
    q, h = jax.block_until_ready((q, h))
    assert jnp.allclose(q, q_ref, atol=ATOL, rtol=RTOL), "q mismatch"
    assert jnp.allclose(h, h_ref, atol=ATOL, rtol=RTOL), "h mismatch"

    # --- sequence rollout (entire time loop inside one kernel invocation) ---
    qs_ref, hf_ref = rnn_rollout_ref(obs_seq, hidden_state, params, RNN_HIDDEN)
    qs, hf = rnn_rollout(obs_seq, hidden_state, packed,
                         rnn_hidden_dim=RNN_HIDDEN, n_actions=N_ACTIONS)
    qs, hf = jax.block_until_ready((qs, hf))
    assert jnp.allclose(qs, qs_ref, atol=ATOL, rtol=RTOL), "q_seq mismatch"
    assert jnp.allclose(hf, hf_ref, atol=ATOL, rtol=RTOL), "h_final mismatch"

    print("KERNEL_OK")
</pallas_src>

<mosaic_0001>
module attributes {stable_mosaic.version = 11 : i64} {
  func.func @_rnn_cell_kernel(%arg0: memref<32x32xf32, #tpu.memory_space<vmem>>, %arg1: memref<32x128xf32, #tpu.memory_space<vmem>>, %arg2: memref<32x128xbf16, #tpu.memory_space<vmem>>, %arg3: memref<1x128xf32, #tpu.memory_space<vmem>>, %arg4: memref<128x384xbf16, #tpu.memory_space<vmem>>, %arg5: memref<1x384xf32, #tpu.memory_space<vmem>>, %arg6: memref<128x384xbf16, #tpu.memory_space<vmem>>, %arg7: memref<1x384xf32, #tpu.memory_space<vmem>>, %arg8: memref<128x128xbf16, #tpu.memory_space<vmem>>, %arg9: memref<1x128xf32, #tpu.memory_space<vmem>>, %arg10: memref<32x128xf32, #tpu.memory_space<vmem>>, %arg11: memref<32x128xf32, #tpu.memory_space<vmem>>) attributes {dimension_semantics = [], scalar_prefetch = 0 : i64, scratch_operands = 0 : i64, tpu.core_type = #tpu.core_type<tc>} {
    %c0 = arith.constant 0 : index
    %c0_0 = arith.constant 0 : index
    %0 = vector.load %arg0[%c0, %c0_0] : memref<32x32xf32, #tpu.memory_space<vmem>>, vector<32x32xf32>
    %c0_1 = arith.constant 0 : index
    %c0_2 = arith.constant 0 : index
    %1 = vector.load %arg1[%c0_1, %c0_2] : memref<32x128xf32, #tpu.memory_space<vmem>>, vector<32x128xf32>
    %c0_3 = arith.constant 0 : index
    %c0_4 = arith.constant 0 : index
    %2 = vector.load %arg2[%c0_3, %c0_4] : memref<32x128xbf16, #tpu.memory_space<vmem>>, vector<32x128xbf16>
    %c0_5 = arith.constant 0 : index
    %c0_6 = arith.constant 0 : index
    %3 = vector.load %arg3[%c0_5, %c0_6] : memref<1x128xf32, #tpu.memory_space<vmem>>, vector<1x128xf32>
    %c0_7 = arith.constant 0 : index
    %c0_8 = arith.constant 0 : index
    %4 = vector.load %arg4[%c0_7, %c0_8] : memref<128x384xbf16, #tpu.memory_space<vmem>>, vector<128x384xbf16>
    %c0_9 = arith.constant 0 : index
    %c0_10 = arith.constant 0 : index
    %5 = vector.load %arg5[%c0_9, %c0_10] : memref<1x384xf32, #tpu.memory_space<vmem>>, vector<1x384xf32>
    %c0_11 = arith.constant 0 : index
    %c0_12 = arith.constant 0 : index
    %6 = vector.load %arg6[%c0_11, %c0_12] : memref<128x384xbf16, #tpu.memory_space<vmem>>, vector<128x384xbf16>
    %c0_13 = arith.constant 0 : index
    %c0_14 = arith.constant 0 : index
    %7 = vector.load %arg7[%c0_13, %c0_14] : memref<1x384xf32, #tpu.memory_space<vmem>>, vector<1x384xf32>
    %c0_15 = arith.constant 0 : index
    %c0_16 = arith.constant 0 : index
    %8 = vector.load %arg8[%c0_15, %c0_16] : memref<128x128xbf16, #tpu.memory_space<vmem>>, vector<128x128xbf16>
    %c0_17 = arith.constant 0 : index
    %c0_18 = arith.constant 0 : index
    %9 = vector.load %arg9[%c0_17, %c0_18] : memref<1x128xf32, #tpu.memory_space<vmem>>, vector<1x128xf32>
    %10 = arith.truncf %0 : vector<32x32xf32> to vector<32x32xbf16>
    %cst = arith.constant dense<0.000000e+00> : vector<32x128xf32>
    %11 = tpu.matmul %10, %2, %cst {dimension_numbers = #tpu.dot_dimension_numbers<[1], [0], [0], [1], [0, 0, 1, 1], [], []>} : vector<32x32xbf16>, vector<32x128xbf16>, vector<32x128xf32> -> vector<32x128xf32>
    %12 = vector.broadcast %3 : vector<1x128xf32> to vector<32x128xf32>
    %13 = arith.addf %11, %12 : vector<32x128xf32>
    %cst_19 = arith.constant 0.000000e+00 : f32
    %14 = vector.broadcast %cst_19 : f32 to vector<32x128xf32>
    %15 = arith.maximumf %13, %14 : vector<32x128xf32>
    %16 = arith.truncf %15 : vector<32x128xf32> to vector<32x128xbf16>
    %cst_20 = arith.constant dense<0.000000e+00> : vector<32x384xf32>
    %17 = tpu.matmul %16, %4, %cst_20 {dimension_numbers = #tpu.dot_dimension_numbers<[1], [0], [0], [1], [0, 0, 1, 1], [], []>} : vector<32x128xbf16>, vector<128x384xbf16>, vector<32x384xf32> -> vector<32x384xf32>
    %18 = vector.broadcast %5 : vector<1x384xf32> to vector<32x384xf32>
    %19 = arith.addf %17, %18 : vector<32x384xf32>
    %20 = arith.truncf %1 : vector<32x128xf32> to vector<32x128xbf16>
    %cst_21 = arith.constant dense<0.000000e+00> : vector<32x384xf32>
    %21 = tpu.matmul %20, %6, %cst_21 {dimension_numbers = #tpu.dot_dimension_numbers<[1], [0], [0], [1], [0, 0, 1, 1], [], []>} : vector<32x128xbf16>, vector<128x384xbf16>, vector<32x384xf32> -> vector<32x384xf32>
    %22 = vector.broadcast %7 : vector<1x384xf32> to vector<32x384xf32>
    %23 = arith.addf %21, %22 : vector<32x384xf32>
    %24 = vector.extract_strided_slice %19 {offsets = [0, 0], sizes = [32, 128], strides = [1, 1]} : vector<32x384xf32> to vector<32x128xf32>
    %25 = vector.extract_strided_slice %23 {offsets = [0, 0], sizes = [32, 128], strides = [1, 1]} : vector<32x384xf32> to vector<32x128xf32>
    %26 = arith.addf %24, %25 : vector<32x128xf32>
    %27 = arith.negf %26 : vector<32x128xf32>
    %28 = math.exp %27 : vector<32x128xf32>
    %cst_22 = arith.constant 1.000000e+00 : f32
    %29 = vector.broadcast %cst_22 : f32 to vector<32x128xf32>
    %30 = arith.addf %29, %28 : vector<32x128xf32>
    %31 = arith.divf %29, %30 : vector<32x128xf32>
    %32 = vector.extract_strided_slice %19 {offsets = [0, 128], sizes = [32, 128], strides = [1, 1]} : vector<32x384xf32> to vector<32x128xf32>
    %33 = vector.extract_strided_slice %23 {offsets = [0, 128], sizes = [32, 128], strides = [1, 1]} : vector<32x384xf32> to vector<32x128xf32>
    %34 = arith.addf %32, %33 : vector<32x128xf32>
    %35 = arith.negf %34 : vector<32x128xf32>
    %36 = math.exp %35 : vector<32x128xf32>
    %cst_23 = arith.constant 1.000000e+00 : f32
    %37 = vector.broadcast %cst_23 : f32 to vector<32x128xf32>
    %38 = arith.addf %37, %36 : vector<32x128xf32>
    %39 = arith.divf %37, %38 : vector<32x128xf32>
    %40 = vector.extract_strided_slice %19 {offsets = [0, 256], sizes = [32, 128], strides = [1, 1]} : vector<32x384xf32> to vector<32x128xf32>
    %41 = vector.extract_strided_slice %23 {offsets = [0, 256], sizes = [32, 128], strides = [1, 1]} : vector<32x384xf32> to vector<32x128xf32>
    %42 = arith.mulf %31, %41 : vector<32x128xf32>
    %43 = arith.addf %40, %42 : vector<32x128xf32>
    %44 = math.tanh %43 : vector<32x128xf32>
    %cst_24 = arith.constant 1.000000e+00 : f32
    %45 = vector.broadcast %cst_24 : f32 to vector<32x128xf32>
    %46 = arith.subf %45, %39 : vector<32x128xf32>
    %47 = arith.mulf %46, %44 : vector<32x128xf32>
    %48 = arith.mulf %39, %1 : vector<32x128xf32>
    %49 = arith.addf %47, %48 : vector<32x128xf32>
    %50 = arith.truncf %49 : vector<32x128xf32> to vector<32x128xbf16>
    %cst_25 = arith.constant dense<0.000000e+00> : vector<32x128xf32>
    %51 = tpu.matmul %50, %8, %cst_25 {dimension_numbers = #tpu.dot_dimension_numbers<[1], [0], [0], [1], [0, 0, 1, 1], [], []>} : vector<32x128xbf16>, vector<128x128xbf16>, vector<32x128xf32> -> vector<32x128xf32>
    %52 = vector.broadcast %9 : vector<1x128xf32> to vector<32x128xf32>
    %53 = arith.addf %51, %52 : vector<32x128xf32>
    %c0_26 = arith.constant 0 : index
    %c0_27 = arith.constant 0 : index
    %54 = vector.load %arg10[%c0_26, %c0_27] : memref<32x128xf32, #tpu.memory_space<vmem>>, vector<32x128xf32>
    tpu.vector_store %arg10[%c0_26, %c0_27], %53 {strides = array<i32>} : memref<32x128xf32, #tpu.memory_space<vmem>>, vector<32x128xf32>,
    %c0_28 = arith.constant 0 : index
    %c0_29 = arith.constant 0 : index
    %55 = vector.load %arg11[%c0_28, %c0_29] : memref<32x128xf32, #tpu.memory_space<vmem>>, vector<32x128xf32>
    tpu.vector_store %arg11[%c0_28, %c0_29], %49 {strides = array<i32>} : memref<32x128xf32, #tpu.memory_space<vmem>>, vector<32x128xf32>,
    return
  }
}

</mosaic_0001>

<bundles_post_ra>
// kernel: rnn_forward.1
= control target key start
LH: loop header
LB: loop body
LE: loop exit
PB: predicated region body
PF: predicated region fallthrough
CT: control target
= control target key end

     0   :  { %17 = vsyncpa [#allocation3], 0  ;;  %s1577_s0 = inlined_call_operand.vmem [shape: f32[32,32], index: 0, kind: input, shape index: {}]   ;;  %s1578_s1 = inlined_call_operand.vmem [shape: f32[32,128], index: 1, kind: input, shape index: {}, may-alias: {1,11}]   ;;  %s1579_s2 = inlined_call_operand.hbm [shape: bf16[32,128], index: 2, kind: input, shape index: {}]   ;;  %s1580_s3 = inlined_call_operand.vmem [shape: f32[1,128], index: 3, kind: input, shape index: {}]   ;;  %s1581_s4 = inlined_call_operand.hbm [shape: bf16[128,384], index: 4, kind: input, shape index: {}]   ;;  %s1582_s5 = inlined_call_operand.vmem [shape: f32[1,384], index: 5, kind: input, shape index: {}]   ;;  %s1583_s6 = inlined_call_operand.hbm [shape: bf16[128,384], index: 6, kind: input, shape index: {}]   ;;  %s1584_s7 = inlined_call_operand.hbm [shape: f32[1,384], index: 7, kind: input, shape index: {}]   ;;  %s1585_s8 = inlined_call_operand.hbm [shape: bf16[128,128], index: 8, kind: input, shape index: {}]   ;;  %s1586_s9 = inlined_call_operand.vmem [shape: f32[1,128], index: 9, kind: input, shape index: {}]   ;;  %s1587_s10 = inlined_call_operand.vmem [shape: f32[32,128], index: 10, kind: output, shape index: {0}]   ;;  %s1588_s11 = inlined_call_operand.vmem [shape: f32[32,128], index: 11, kind: output, shape index: {1}, may-alias: {1,11}]  }
   0x1   :  { %18 = vsyncpa [#allocation5], 0 }
   0x2   :  { %19 = vsyncpa [#allocation8], 0  ;;  %s1386_s17 = smov [#allocation4]  }
   0x3   :  { %s43_s18 = sshll.u32 %s1386_s17, 4  ;;  %s44_s18 = int_to_ptr.vmem [resolvable:$true] %s43_s18 }
   0x4   :  { %s1288_s19 = scalar_lea.vmem %s44_s18, 3072  ;;  %p1293_p1 = scmp.lt.s32.totalorder %s44_s18, %s44_s18 }
   0x5   :  { %p1289_p0 = scmp.ne.s32.totalorder %s44_s18, %s1288_s19  ;;  %p1294_p2 = scmp.lt.s32.totalorder %s1288_s19, %s1288_s19 }
   0x7   :  { %p1295_p3 = por %p1294_p2, %p1293_p1 }
   0x9   :  { %p1296_p4 = pnand %p1295_p3, %p1289_p0 }
   0xb   :  { %1299 = shalt.err (!%p1296_p4)
}
   0xc   :  { %s1387_s20 = smov 192   ;;  %s1388_s21 = smov 12  }
   0xd   :  { %49 = dma.hbm_to_vmem [thread:$0]  %s1581_s4, 3072, %s44_s18, [#allocation5], %s1387_s20, %s1387_s20, %s1388_s21  }
   0xe   :  { %s1389_s24 = smov [#allocation7]   ;;  %s1390_s26 = smov [#allocation2]  }
   0xf   :  { %s70_s25 = sshll.u32 %s1389_s24, 4  ;;  %s29_s27 = sshll.u32 %s1390_s26, 4  ;;  %s71_s25 = int_to_ptr.vmem [resolvable:$true] %s70_s25  ;;  %s30_s27 = int_to_ptr.vmem [resolvable:$true] %s29_s27 }
  0x10   :  { %s1308_s28 = scalar_lea.vmem %s71_s25, 48  ;;  %s1312_s29 = scalar_lea.vmem %s71_s25, 64 }
  0x11   :  { %p1309_p5 = scmp.ne.s32.totalorder %s71_s25, %s1308_s28  ;;  %p1313_p6 = scmp.lt.s32.totalorder %s71_s25, %s71_s25 }
  0x12   :  { %p1314_p7 = scmp.lt.s32.totalorder %s1312_s29, %s1308_s28 }
  0x14   :  { %p1315_p8 = por %p1314_p7, %p1313_p6 }
  0x16   :  { %p1316_p9 = pnand %p1315_p8, %p1309_p5 }
  0x18   :  { %1319 = shalt.err (!%p1316_p9)
}
  0x19   :  { %73 = dma.hbm_to_vmem [thread:$0]  %s1584_s7, 48, %s71_s25, [#allocation8]  }
  0x1a   :  { %s1328_s13 = scalar_lea.vmem %s30_s27, 256  ;;  %p1333_p11 = scmp.lt.s32.totalorder %s30_s27, %s30_s27 }
  0x1b   :  { %p1329_p10 = scmp.ne.s32.totalorder %s30_s27, %s1328_s13  ;;  %p1334_p12 = scmp.lt.s32.totalorder %s1328_s13, %s1328_s13 }
  0x1d   :  { %p1335_p13 = por %p1334_p12, %p1333_p11 }
  0x1f   :  { %p1336_p0 = pnand %p1335_p13, %p1329_p10 }
  0x21   :  { %1339 = shalt.err (!%p1336_p0)
}
  0x22   :  { %s1391_s4 = smov 64   ;;  %s1392_s14 = smov 4  }
  0x23   :  { %35 = dma.hbm_to_vmem [thread:$0]  %s1579_s2, 256, %s30_s27, [#allocation3], %s1391_s4, %s1391_s4, %s1392_s14  }
  0x24   :  { %s1393_s17 = smov [#allocation6]   ;;  %s1394_s19 = smov [#allocation9]  }
  0x25   :  { %s57_s18 = sshll.u32 %s1393_s17, 4  ;;  %s79_s22 = sshll.u32 %s1394_s19, 4  ;;  %s58_s18 = int_to_ptr.vmem [resolvable:$true] %s57_s18  ;;  %s80_s22 = int_to_ptr.vmem [resolvable:$true] %s79_s22 }
  0x26   :  { %s1348_s7 = scalar_lea.vmem %s58_s18, 3072  ;;  %p1353_p2 = scmp.lt.s32.totalorder %s58_s18, %s58_s18 }
  0x27   :  { %p1349_p1 = scmp.ne.s32.totalorder %s58_s18, %s1348_s7  ;;  %p1354_p3 = scmp.lt.s32.totalorder %s1348_s7, %s1348_s7 }
  0x29   :  { %p1355_p4 = por %p1354_p3, %p1353_p2 }
  0x2b   :  { %p1356_p5 = pnand %p1355_p4, %p1349_p1 }
  0x2d   :  { %1359 = shalt.err (!%p1356_p5)
}
  0x2e   :  { %63 = dma.hbm_to_vmem [thread:$0]  %s1583_s6, 3072, %s58_s18, [#allocation5], %s1387_s20, %s1387_s20, %s1388_s21  }
  0x2f   :  { %s1368_s2 = scalar_lea.vmem %s80_s22, 1024  ;;  %p1373_p7 = scmp.lt.s32.totalorder %s80_s22, %s80_s22 }
  0x30   :  { %p1369_p6 = scmp.ne.s32.totalorder %s80_s22, %s1368_s2  ;;  %p1374_p8 = scmp.lt.s32.totalorder %s1368_s2, %s1368_s2 }
  0x32   :  { %p1375_p9 = por %p1374_p8, %p1373_p7 }
  0x34   :  { %p1376_p10 = pnand %p1375_p9, %p1369_p6 }
  0x36   :  { %1379 = shalt.err (!%p1376_p10)
}
  0x37   :  { %85 = dma.hbm_to_vmem [thread:$0]  %s1585_s8, 1024, %s80_s22, [#allocation8], %s1391_s4, %s1391_s4, %s1392_s14  }
  0x38   :  { %1380 = dma.done.wait [#allocation3], 256  }
  0x39   :  { %1381 = vsyncadd [#allocation3], 4294967040 }
  0x3a   :  { %1382 = dma.done.wait [#allocation5], 6144  }
  0x3b   :  { %1383 = vsyncadd [#allocation5], 4294961152 }
  0x3c   :  { %1384 = dma.done.wait [#allocation8], 1072  }
  0x3d   :  { %1385 = vsyncadd [#allocation8], 4294966224  ;;  %v1166_v0 = vld [vmem:[#allocation2 + $0x8] sm:$0xff]   ;;  %v1167_v1 = vld [vmem:[#allocation2] sm:$0xff]   ;;  %vm220_vm0 = vcmask 261120   ;;  %v1395_v33 = vmov 0  }
  0x3e   :  { %1088 = vmatprep.subr.bf16.mxu0 %v1166_v0  ;;  %v104_v2 = vld [vmem:[%s1577_s0] sm:$0xff]  ;;  %v105_v3 = vld [vmem:[%s1577_s0 + $0x8] sm:$0xff]  ;;  %v106_v4 = vld [vmem:[%s1577_s0 + $0x10] sm:$0xff]  ;;  %458 = vmatprep.mubr.bf16.mxu1 %v1395_v33 }
  0x3f   :  { %1089 = vmatpush3.bf16.msra.mxu0 %v1166_v0  ;;  %v200_v5 = vpack.c.bf16 %v105_v3, %v104_v2  ;;  %v107_v6 = vld [vmem:[%s1577_s0 + $0x18] sm:$0xff]  ;;  %v1171_v9 = vld [vmem:[#allocation4 + $0xb0] ss:$12 sps:$4 sm:$0xff]   ;;  %v1172_v11 = vld [vmem:[#allocation4 + $0x94] ss:$12 sps:$4 sm:$0xff]  }
  0x40   :  { %1090 = vmatprep.subr.bf16.mxu0 %v1167_v1  ;;  %v1168_v7 = vld [vmem:[#allocation4 + $0xac] ss:$12 sps:$4 sm:$0xff]   ;;  %v1170_v8 = vld [vmem:[#allocation4 + $0xa8] ss:$12 sps:$4 sm:$0xff]   ;;  %v201_v10 = vpack.c.bf16 %v107_v6, %v106_v4  ;;  %v1174_v12 = vld [vmem:[#allocation4 + $0x90] ss:$12 sps:$4 sm:$0xff]  }
  0x41   :  { %1092 = vmatprep.mubr.msk.bf16.mxu0 %vm220_vm0, %v200_v5  ;;  %426 = vmatprep.subr.bf16.mxu1 %v1168_v7  ;;  %v1175_v13 = vld [vmem:[#allocation4 + $0x98] ss:$12 sps:$4 sm:$0xff]   ;;  %v1176_v14 = vld [vmem:[#allocation4 + $0x7c] ss:$12 sps:$4 sm:$0xff]   ;;  %v1179_v16 = vld [vmem:[#allocation4 + $0x80] ss:$12 sps:$4 sm:$0xff]  }
  0x42   :  { %427 = vmatpush1.bf16.msra.mxu1 %v1170_v8  ;;  %v1178_v15 = vld [vmem:[#allocation4 + $0x78] ss:$12 sps:$4 sm:$0xff]   ;;  %v1182_v18 = vld [vmem:[#allocation4 + $0x60] ss:$12 sps:$4 sm:$0xff]   ;;  %v1183_v19 = vld [vmem:[#allocation4 + $0x68] ss:$12 sps:$4 sm:$0xff]  }
  0x43   :  { %1091 = vmatpush3.bf16.msra.mxu0 %v1167_v1  ;;  %428 = vmatprep.subr.bf16.mxu1 %v1172_v11  ;;  %v1180_v17 = vld [vmem:[#allocation4 + $0x64] ss:$12 sps:$4 sm:$0xff]   ;;  %v1184_v20 = vld [vmem:[#allocation4 + $0x4c] ss:$12 sps:$4 sm:$0xff]   ;;  %v1186_v21 = vld [vmem:[#allocation4 + $0x48] ss:$12 sps:$4 sm:$0xff]  }
  0x44   :  { %1096 = vmatprep.subr.bf16.mxu0 %v1171_v9  ;;  %v1187_v22 = vld [vmem:[#allocation4 + $0x50] ss:$12 sps:$4 sm:$0xff]   ;;  %v1188_v23 = vld [vmem:[#allocation4 + $0x34] ss:$12 sps:$4 sm:$0xff]   ;;  %v1191_v25 = vld [vmem:[#allocation4 + $0x38] ss:$12 sps:$4 sm:$0xff]  }
  0x45   :  { %v1190_v24 = vld [vmem:[#allocation4 + $0x30] ss:$12 sps:$4 sm:$0xff]   ;;  %v1194_v27 = vld [vmem:[#allocation4 + $0x18] ss:$12 sps:$4 sm:$0xff]   ;;  %v1195_v28 = vld [vmem:[#allocation4 + $0x20] ss:$12 sps:$4 sm:$0xff]  }
  0x46   :  { %1093 = vmatmul.mubr.msk.bf16.vlgmr.msra.gmra.mxu0 %vm220_vm0, %v201_v10  ;;  %429 = vmatpush1.bf16.msra.mxu1 %v1174_v12  ;;  %v1192_v26 = vld [vmem:[#allocation4 + $0x1c] ss:$12 sps:$4 sm:$0xff]   ;;  %v1196_v29 = vld [vmem:[#allocation4 + $0x4] ss:$12 sps:$4 sm:$0xff]   ;;  %v1198_v30 = vld [vmem:[#allocation4] ss:$12 sps:$4 sm:$0xff]  }
  0x47   :  { %1097 = vmatpush3.bf16.msra.mxu0 %v1171_v9  ;;  %430 = vmatprep.subr.bf16.mxu1 %v1176_v14  ;;  %v1199_v31 = vld [vmem:[#allocation4 + $0x8] ss:$12 sps:$4 sm:$0xff]   ;;  %v1202_v32 = vld [vmem:[#allocation6 + $0xac] ss:$12 sps:$4 sm:$0xff]   ;;  %v1224_v34 = vld [vmem:[#allocation6 + $0xb0] ss:$12 sps:$4 sm:$0xff]  }
  0x48   :  { %1098 = vmatprep.subr.bf16.mxu0 %v1175_v13  ;;  %v984_v37 = vld [vmem:[%s1580_s3] ss:$0 sm:$0xff]  ;;  %v1200_v48 = vld [vmem:[#allocation6 + $0xa8] ss:$12 sps:$4 sm:$0xff]   ;;  %v1503_v52 = vld [vmem:[%s1578_s1 + $0x8] sm:$0xff] }
  0x49   :  { %v1205_v50 = vld [vmem:[#allocation6 + $0x94] ss:$12 sps:$4 sm:$0xff]   ;;  %v1225_v54 = vld [vmem:[#allocation6 + $0x98] ss:$12 sps:$4 sm:$0xff]   ;;  %v1203_v55 = vld [vmem:[#allocation6 + $0x90] ss:$12 sps:$4 sm:$0xff]  }
  0x4a   :  { %431 = vmatpush1.bf16.msra.mxu1 %v1178_v15  ;;  %v1498_v51 = vld [vmem:[%s1578_s1] sm:$0xff]  ;;  %v1208_v57 = vld [vmem:[#allocation6 + $0x7c] ss:$12 sps:$4 sm:$0xff]   ;;  %v1226_v58 = vld [vmem:[#allocation6 + $0x80] ss:$12 sps:$4 sm:$0xff]  }
  0x4b   :  { %1099 = vmatpush3.bf16.msra.mxu0 %v1175_v13  ;;  %432 = vmatprep.subr.bf16.mxu1 %v1180_v17  ;;  %v528_v56 = vpack.c.bf16 %v1503_v52, %v1498_v51  ;;  %v1206_v59 = vld [vmem:[#allocation6 + $0x78] ss:$12 sps:$4 sm:$0xff]   ;;  %v1227_v61 = vld [vmem:[#allocation6 + $0x68] ss:$12 sps:$4 sm:$0xff]   ;;  %v1209_v62 = vld [vmem:[#allocation6 + $0x60] ss:$12 sps:$4 sm:$0xff]  }
  0x4c   :  { %1100 = vmatprep.subr.bf16.mxu0 %v1179_v16  ;;  %v1211_v60 = vld [vmem:[#allocation6 + $0x64] ss:$12 sps:$4 sm:$0xff]   ;;  %v1214_v63 = vld [vmem:[#allocation6 + $0x4c] ss:$12 sps:$4 sm:$0xff]   ;;  %v1212_v1 = vld [vmem:[#allocation6 + $0x48] ss:$12 sps:$4 sm:$0xff]  }
  0x4d   :  { %v1228_v0 = vld [vmem:[#allocation6 + $0x50] ss:$12 sps:$4 sm:$0xff]   ;;  %v1217_v2 = vld [vmem:[#allocation6 + $0x34] ss:$12 sps:$4 sm:$0xff]   ;;  %v1229_v3 = vld [vmem:[#allocation6 + $0x38] ss:$12 sps:$4 sm:$0xff]  }
  0x4e   :  { %433 = vmatpush1.bf16.msra.mxu1 %v1182_v18  ;;  %v1215_v4 = vld [vmem:[#allocation6 + $0x30] ss:$12 sps:$4 sm:$0xff]   ;;  %v1230_v6 = vld [vmem:[#allocation6 + $0x20] ss:$12 sps:$4 sm:$0xff]   ;;  %v1218_v7 = vld [vmem:[#allocation6 + $0x18] ss:$12 sps:$4 sm:$0xff]  }
  0x4f   :  { %1101 = vmatpush3.bf16.msra.mxu0 %v1179_v16  ;;  %434 = vmatprep.subr.bf16.mxu1 %v1184_v20  ;;  %v1220_v5 = vld [vmem:[#allocation6 + $0x1c] ss:$12 sps:$4 sm:$0xff]   ;;  %v1223_v8 = vld [vmem:[#allocation6 + $0x4] ss:$12 sps:$4 sm:$0xff]   ;;  %v1221_v10 = vld [vmem:[#allocation6] ss:$12 sps:$4 sm:$0xff]  }
  0x50   :  { %1102 = vmatprep.subr.bf16.mxu0 %v1183_v19  ;;  %v1231_v9 = vld [vmem:[#allocation6 + $0x8] ss:$12 sps:$4 sm:$0xff]   ;;  %v1512_v11 = vld [vmem:[%s1578_s1 + $0x10] sm:$0xff]  ;;  %v1234_v16 = vld [vmem:[#allocation9 + $0x28] sm:$0xff]  }
  0x51   :  { %v1517_v12 = vld [vmem:[%s1578_s1 + $0x18] sm:$0xff]  ;;  %v1232_v14 = vld [vmem:[#allocation9 + $0x38] sm:$0xff]   ;;  %v1233_v15 = vld [vmem:[#allocation9 + $0x30] sm:$0xff]  }
  0x52   :  { %435 = vmatpush1.bf16.msra.mxu1 %v1186_v21  ;;  %v529_v13 = vpack.c.bf16 %v1517_v12, %v1512_v11  ;;  %v1235_v17 = vld [vmem:[#allocation9 + $0x20] sm:$0xff]   ;;  %v1236_v18 = vld [vmem:[#allocation9 + $0x18] sm:$0xff]   ;;  %v1238_v20 = vld [vmem:[#allocation9 + $0x8] sm:$0xff]  }
  0x53   :  { %1103 = vmatpush3.bf16.msra.mxu0 %v1183_v19  ;;  %436 = vmatprep.subr.bf16.mxu1 %v1188_v23  ;;  %v1237_v19 = vld [vmem:[#allocation9 + $0x10] sm:$0xff]   ;;  %v1239_v21 = vld [vmem:[#allocation9] sm:$0xff]  }
  0x54   :  { %1104 = vmatprep.subr.bf16.mxu0 %v1187_v22 }
  0x56   :  { %437 = vmatpush1.bf16.msra.mxu1 %v1190_v24 }
  0x57   :  { %1105 = vmatpush3.bf16.msra.mxu0 %v1187_v22  ;;  %438 = vmatprep.subr.bf16.mxu1 %v1192_v26  ;;  %v283_v26 = vlaneseq }
  0x58   :  { %1106 = vmatprep.subr.bf16.mxu0 %v1191_v25 }
  0x5a   :  { %439 = vmatpush1.bf16.msra.mxu1 %v1194_v27 }
  0x5b   :  { %1107 = vmatpush3.bf16.msra.mxu0 %v1191_v25  ;;  %440 = vmatprep.subr.bf16.mxu1 %v1196_v29 }
  0x5c   :  { %1108 = vmatprep.subr.bf16.mxu0 %v1195_v28 }
  0x5e   :  { %441 = vmatpush1.bf16.msra.mxu1 %v1198_v30 }
  0x5f   :  { %1109 = vmatpush3.bf16.msra.mxu0 %v1195_v28  ;;  %674 = vmatprep.subr.bf16.mxu1 %v1202_v32  ;;  %v1522_v28 = vshrl.u32 %v283_v26, 7 }
  0x60   :  { %1110 = vmatprep.subr.bf16.mxu0 %v1199_v31 }
  0x61   :  { %v285_v30 = vsub.s32 0, %v1522_v28 }
  0x63   :  { %1111 = vmatpush3.bf16.msra.mxu0 %v1199_v31  ;;  %v1528_v31 = vld [vmem:[%s1582_s5] sm:$0x7] }
  0x64   :  { %1116 = vmatprep.subr.bf16.mxu0 %v1224_v34 }
 0x106   :  { %v1094_v35 = vpop.f32.mrf.mxu0 }
 0x107   :  { %v270_v41 = vadd.f32 %v1094_v35, %v984_v37 }
 0x108   :  { %v261_v36 = vpop.f32.mrf.mxu0 }
 0x109   :  { %v262_v39 = vadd.f32 %v984_v37, %v261_v36  ;;  %v278_v47 = vmax.f32 %v270_v41, 0.0 }
 0x10a   :  { %v1095_v38 = vpop.f32.mrf.mxu0 }
 0x10b   :  { %v273_v40 = vadd.f32 %v1095_v38, %v984_v37  ;;  %v276_v45 = vmax.f32 %v262_v39, 0.0 }
 0x10c   :  { %v264_v42 = vpop.f32.mrf.mxu0 }
 0x10d   :  { %v265_v43 = vadd.f32 %v984_v37, %v264_v42  ;;  %v279_v44 = vmax.f32 %v273_v40, 0.0  ;;  %v289_v37 = vsub.s32 1, %v1522_v28 }
 0x10f   :  { %v277_v46 = vmax.f32 %v265_v43, 0.0  ;;  %v281_v53 = vpack.c.bf16 %v279_v44, %v278_v47  ;;  %v290_v43 = vrot.slane %v1528_v31, %v289_v37 }
 0x111   :  { %v280_v49 = vpack.c.bf16 %v277_v46, %v276_v45 }
 0x113   :  { %459 = vmatmul.mubr.bf16.vlgmr.msra.gmra.mxu1 %v280_v49  ;;  %1112 = vmatprep.mubr.bf16.mxu0 %v280_v49 }
 0x114   :  { %675 = vmatpush1.bf16.msra.mxu1 %v1200_v48  ;;  %1113 = vmatmul.mubr.bf16.vlgmr.msra.gmra.mxu0 %v281_v53 }
 0x115   :  { %676 = vmatprep.subr.bf16.mxu1 %v1205_v50  ;;  %468 = vmatprep.mubr.bf16.mxu1 %v1395_v33 }
 0x116   :  { %1117 = vmatpush3.bf16.msra.mxu0 %v1224_v34  ;;  %1132 = vmatprep.mubr.bf16.mxu0 %v528_v56  ;;  %v286_v34 = vrot.slane %v1528_v31, %v285_v30 }
 0x117   :  { %1118 = vmatprep.subr.bf16.mxu0 %v1225_v54 }
 0x118   :  { %677 = vmatpush1.bf16.msra.mxu1 %v1203_v55 }
 0x119   :  { %678 = vmatprep.subr.bf16.mxu1 %v1208_v57 }
 0x11a   :  { %1119 = vmatpush3.bf16.msra.mxu0 %v1225_v54 }
 0x11b   :  { %469 = vmatmul.mubr.bf16.gmra.mxu1 %v281_v53  ;;  %1120 = vmatprep.subr.bf16.mxu0 %v1226_v58 }
 0x11c   :  { %679 = vmatpush1.bf16.msra.mxu1 %v1206_v59  ;;  %706 = vmatprep.mubr.bf16.mxu1 %v1395_v33 }
 0x11d   :  { %680 = vmatprep.subr.bf16.mxu1 %v1211_v60 }
 0x11e   :  { %1121 = vmatpush3.bf16.msra.mxu0 %v1226_v58 }
 0x11f   :  { %1122 = vmatprep.subr.bf16.mxu0 %v1227_v61 }
 0x120   :  { %681 = vmatpush1.bf16.msra.mxu1 %v1209_v62 }
 0x121   :  { %682 = vmatprep.subr.bf16.mxu1 %v1214_v63 }
 0x122   :  { %1123 = vmatpush3.bf16.msra.mxu0 %v1227_v61 }
 0x123   :  { %1124 = vmatprep.subr.bf16.mxu0 %v1228_v0 }
 0x124   :  { %683 = vmatpush1.bf16.msra.mxu1 %v1212_v1 }
 0x125   :  { %684 = vmatprep.subr.bf16.mxu1 %v1217_v2 }
 0x126   :  { %1125 = vmatpush3.bf16.msra.mxu0 %v1228_v0 }
 0x127   :  { %1126 = vmatprep.subr.bf16.mxu0 %v1229_v3 }
 0x128   :  { %685 = vmatpush1.bf16.msra.mxu1 %v1215_v4 }
 0x129   :  { %686 = vmatprep.subr.bf16.mxu1 %v1220_v5 }
 0x12a   :  { %1127 = vmatpush3.bf16.msra.mxu0 %v1229_v3 }
 0x12b   :  { %1128 = vmatprep.subr.bf16.mxu0 %v1230_v6 }
 0x12c   :  { %687 = vmatpush1.bf16.msra.mxu1 %v1218_v7 }
 0x12d   :  { %688 = vmatprep.subr.bf16.mxu1 %v1223_v8 }
 0x12e   :  { %1129 = vmatpush3.bf16.msra.mxu0 %v1230_v6 }
 0x12f   :  { %1130 = vmatprep.subr.bf16.mxu0 %v1231_v9 }
 0x130   :  { %689 = vmatpush1.bf16.msra.mxu1 %v1221_v10 }
 0x131   :  { %1136 = vmatprep.subr.bf16.mxu1 %v1232_v14 }
 0x132   :  { %1131 = vmatpush3.bf16.msra.mxu0 %v1231_v9 }
 0x133   :  { %707 = vmatmul.mubr.bf16.vlgmr.msra.gmra.mxu1 %v528_v56 }
 0x134   :  { %716 = vmatprep.mubr.bf16.mxu1 %v1395_v33  ;;  %1137 = vmatpush3.bf16.msra.mxu1 %v1232_v14  ;;  %v1530_v33 = vld [vmem:[#allocation7] sm:$0x7] }
 0x135   :  { %1133 = vmatmul.mubr.bf16.vlgmr.msra.gmra.mxu0 %v529_v13  ;;  %1138 = vmatprep.subr.bf16.mxu1 %v1233_v15  ;;  %v534_v35 = vrot.slane %v1530_v33, %v285_v30  ;;  %v538_v41 = vrot.slane %v1530_v33, %v289_v37 }
 0x138   :  { %1139 = vmatpush3.bf16.msra.mxu1 %v1233_v15 }
 0x139   :  { %1140 = vmatprep.subr.bf16.mxu1 %v1234_v16 }
 0x13b   :  { %717 = vmatmul.mubr.bf16.gmra.mxu1 %v529_v13 }
 0x13c   :  { %1141 = vmatpush3.bf16.msra.mxu1 %v1234_v16 }
 0x13d   :  { %1142 = vmatprep.subr.bf16.mxu1 %v1235_v17 }
 0x140   :  { %1143 = vmatpush3.bf16.msra.mxu1 %v1235_v17 }
 0x141   :  { %1144 = vmatprep.subr.bf16.mxu1 %v1236_v18 }
 0x144   :  { %1145 = vmatpush3.bf16.msra.mxu1 %v1236_v18 }
 0x145   :  { %1146 = vmatprep.subr.bf16.mxu1 %v1237_v19 }
 0x148   :  { %1147 = vmatpush3.bf16.msra.mxu1 %v1237_v19 }
 0x149   :  { %1148 = vmatprep.subr.bf16.mxu1 %v1238_v20 }
 0x14c   :  { %1149 = vmatpush3.bf16.msra.mxu1 %v1238_v20 }
 0x14d   :  { %1150 = vmatprep.subr.bf16.mxu1 %v1239_v21 }
 0x150   :  { %1151 = vmatpush3.bf16.msra.mxu1 %v1239_v21 }
 0x1d3   :  { %v460_v22 = vpop.f32.mrf.mxu1 }
 0x1d4   :  { %v461_v39 = vadd.f32 %v460_v22, %v286_v34  ;;  %v1537_v55 = vpop.f32.mrf.mxu0 }
 0x1d5   :  { %v462_v23 = vpop.f32.mrf.mxu1 }
 0x1d6   :  { %v463_v53 = vadd.f32 %v462_v23, %v290_v43  ;;  %v513_v1 = vpop.f32.mrf.mxu0 }
 0x1d7   :  { %v464_v24 = vpop.f32.mrf.mxu1 }
 0x1d8   :  { %v465_v46 = vadd.f32 %v464_v24, %v286_v34  ;;  %v1539_v14 = vpop.f32.mrf.mxu0 }
 0x1d9   :  { %v466_v25 = vpop.f32.mrf.mxu1 }
 0x1da   :  { %v467_v62 = vadd.f32 %v466_v25, %v290_v43  ;;  %v516_v21 = vpop.f32.mrf.mxu0 }
 0x1db   :  { %v470_v27 = vpop.f32.mrf.mxu1 }
 0x1dc   :  { %v471_v58 = vadd.f32 %v470_v27, %v286_v34 }
 0x1dd   :  { %v472_v29 = vpop.f32.mrf.mxu1 }
 0x1de   :  { %v473_v9 = vadd.f32 %v472_v29, %v290_v43 }
 0x1df   :  { %v474_v32 = vpop.f32.mrf.mxu1 }
 0x1e0   :  { %v475_v5 = vadd.f32 %v474_v32, %v286_v34  ;;  %v293_v32 = vsub.s32 2, %v1522_v28 }
 0x1e1   :  { %v476_v36 = vpop.f32.mrf.mxu1 }
 0x1e2   :  { %v477_v19 = vadd.f32 %v476_v36, %v290_v43  ;;  %v542_v36 = vrot.slane %v1530_v33, %v293_v32 }
 0x1f3   :  { %v708_v38 = vpop.f32.mrf.mxu1 }
 0x1f4   :  { %v709_v40 = vadd.f32 %v708_v38, %v534_v35 }
 0x1f5   :  { %v710_v42 = vpop.f32.mrf.mxu1  ;;  %v1134_v25 = vpop.f32.mrf.mxu0 }
 0x1f6   :  { %v776_v44 = vadd.f32 %v709_v40, %v461_v39  ;;  %v711_v48 = vadd.f32 %v710_v42, %v538_v41 }
 0x1f7   :  { %v712_v45 = vpop.f32.mrf.mxu1  ;;  %v761_v30 = vpop.f32.mrf.mxu0 }
 0x1f8   :  { %v1037_v47 = vmul.f32 -1.442695, %v776_v44  ;;  %v713_v49 = vadd.f32 %v712_v45, %v534_v35  ;;  %v804_v59 = vadd.f32 %v711_v48, %v463_v53  ;;  %v762_v43 = vadd.f32 %v761_v30, %v542_v36 }
 0x1f9   :  { %v714_v50 = vpop.f32.mrf.mxu1  ;;  %v1135_v38 = vpop.f32.mrf.mxu0  ;;  %v294_v45 = vrot.slane %v1528_v31, %v293_v32 }
 0x1fa   :  { %1240 = vpow2.f32 %v1037_v47  ;;  %v777_v54 = vadd.f32 %v713_v49, %v465_v46  ;;  %v715_v56 = vadd.f32 %v714_v50, %v538_v41  ;;  %v1041_v6 = vmul.f32 -1.442695, %v804_v59 }
 0x1fb   :  { %v718_v57 = vpop.f32.mrf.mxu1  ;;  %v764_v44 = vpop.f32.mrf.mxu0  ;;  %v514_v48 = vadd.f32 %v513_v1, %v294_v45  ;;  %v770_v59 = vadd.f32 %v1134_v25, %v542_v36  ;;  %v773_v1 = vadd.f32 %v1135_v38, %v542_v36 }
 0x1fc   :  { %v1038_v60 = vmul.f32 -1.442695, %v777_v54  ;;  %v719_v61 = vadd.f32 %v718_v57, %v534_v35  ;;  %v805_v2 = vadd.f32 %v715_v56, %v467_v62  ;;  %v765_v50 = vadd.f32 %v764_v44, %v542_v36 }
 0x1fd   :  { %v720_v63 = vpop.f32.mrf.mxu1  ;;  %v517_v57 = vadd.f32 %v516_v21, %v294_v45  ;;  %v522_v62 = vadd.f32 %v1537_v55, %v294_v45 }
 0x1fe   :  { %1242 = vpow2.f32 %v1038_v60  ;;  %v778_v0 = vadd.f32 %v719_v61, %v471_v58  ;;  %v721_v3 = vadd.f32 %v720_v63, %v538_v41  ;;  %v1042_v15 = vmul.f32 -1.442695, %v805_v2 }
 0x1ff   :  { %v722_v4 = vpop.f32.mrf.mxu1 }
 0x200   :  { %v1039_v7 = vmul.f32 -1.442695, %v778_v0  ;;  %v723_v8 = vadd.f32 %v722_v4, %v534_v35  ;;  %v806_v16 = vadd.f32 %v721_v3, %v473_v9  ;;  %v525_v3 = vadd.f32 %v1539_v14, %v294_v45 }
 0x201   :  { %v724_v10 = vpop.f32.mrf.mxu1 }
 0x202   :  { %1244 = vpow2.f32 %v1039_v7  ;;  %v779_v13 = vadd.f32 %v723_v8, %v475_v5  ;;  %v725_v17 = vadd.f32 %v724_v10, %v538_v41  ;;  %v1043_v22 = vmul.f32 -1.442695, %v806_v16 }
 0x203   :  { %1246 = vpow2.f32 %v1041_v6 }
 0x204   :  { %v1040_v18 = vmul.f32 -1.442695, %v779_v13  ;;  %v807_v23 = vadd.f32 %v725_v17, %v477_v19 }
 0x206   :  { %1248 = vpow2.f32 %v1040_v18  ;;  %v1044_v27 = vmul.f32 -1.442695, %v807_v23 }
 0x207   :  { %v1241_v20 = vpop.eup %1240  ;;  %1250 = vpow2.f32 %v1042_v15 }
 0x208   :  { %v792_v24 = vadd.f32 1.0, %v1241_v20 }
 0x20a   :  { %1252 = vrcp.f32 %v792_v24 }
 0x20b   :  { %v1243_v26 = vpop.eup %1242  ;;  %1254 = vpow2.f32 %v1043_v22 }
 0x20c   :  { %v793_v29 = vadd.f32 1.0, %v1243_v26 }
 0x20e   :  { %1256 = vrcp.f32 %v793_v29 }
 0x20f   :  { %v1245_v34 = vpop.eup %1244  ;;  %1258 = vpow2.f32 %v1044_v27 }
 0x210   :  { %v794_v35 = vadd.f32 1.0, %v1245_v34  ;;  %v1247_v37 = vpop.eup %1246 }
 0x211   :  { %v820_v41 = vadd.f32 1.0, %v1247_v37 }
 0x212   :  { %1260 = vrcp.f32 %v794_v35 }
 0x213   :  { %v1249_v39 = vpop.eup %1248 }
 0x214   :  { %v1251_v40 = vpop.eup %1250  ;;  %v795_v42 = vadd.f32 1.0, %v1249_v39 }
 0x215   :  { %v821_v28 = vadd.f32 1.0, %v1251_v40 }
 0x216   :  { %1262 = vrcp.f32 %v795_v42 }
 0x217   :  { %v1253_v46 = vpop.eup %1252  ;;  %1264 = vrcp.f32 %v820_v41 }
 0x218   :  { %v1255_v47 = vpop.eup %1254  ;;  %v832_v49 = vmul.f32 %v1253_v46, %v762_v43  ;;  %1266 = vrcp.f32 %v821_v28 }
 0x219   :  { %v822_v54 = vadd.f32 1.0, %v1255_v47 }
 0x21a   :  { %v836_v33 = vadd.f32 %v832_v49, %v514_v48 }
 0x21b   :  { %v1257_v53 = vpop.eup %1256 }
 0x21c   :  { %v1259_v56 = vpop.eup %1258  ;;  %1268 = vtanh.f32 %v836_v33  ;;  %v833_v58 = vmul.f32 %v1257_v53, %v765_v50 }
 0x21d   :  { %1270 = vrcp.f32 %v822_v54  ;;  %v823_v31 = vadd.f32 1.0, %v1259_v56 }
 0x21e   :  { %v837_v60 = vadd.f32 %v833_v58, %v517_v57 }
 0x21f   :  { %v1261_v61 = vpop.eup %1260 }
 0x220   :  { %v834_v63 = vmul.f32 %v1261_v61, %v770_v59  ;;  %1272 = vtanh.f32 %v837_v60 }
 0x221   :  { %1274 = vrcp.f32 %v823_v31 }
 0x222   :  { %v838_v0 = vadd.f32 %v834_v63, %v522_v62 }
 0x223   :  { %v1263_v2 = vpop.eup %1262 }
 0x224   :  { %1276 = vtanh.f32 %v838_v0  ;;  %v835_v4 = vmul.f32 %v1263_v2, %v773_v1  ;;  %v1265_v5 = vpop.eup %1264 }
 0x225   :  { %v1267_v7 = vpop.eup %1266  ;;  %v844_v8 = vsub.f32 1.0, %v1265_v5  ;;  %v852_v13 = vmul.f32 %v1265_v5, %v1498_v51 }
 0x226   :  { %v839_v6 = vadd.f32 %v835_v4, %v525_v3  ;;  %v845_v15 = vsub.f32 1.0, %v1267_v7  ;;  %v853_v19 = vmul.f32 %v1267_v7, %v1503_v52 }
 0x228   :  { %1278 = vtanh.f32 %v839_v6 }
 0x229   :  { %v1269_v9 = vpop.eup %1268 }
 0x22a   :  { %v848_v10 = vmul.f32 %v1269_v9, %v844_v8  ;;  %v1271_v55 = vpop.eup %1270 }
 0x22b   :  { %v846_v21 = vsub.f32 1.0, %v1271_v55  ;;  %v854_v24 = vmul.f32 %v1271_v55, %v1512_v11  ;;  %v1045_v11 = vld [vmem:[%s1586_s9] ss:$0 sm:$0xff] }
 0x22c   :  { %v856_v16 = vadd.f32 %v852_v13, %v848_v10 }
 0x22d   :  { %v1273_v17 = vpop.eup %1272 }
 0x22e   :  { %v849_v18 = vmul.f32 %v1273_v17, %v845_v15  ;;  %969 = vst [vmem:[%s1588_s11] sm:$0xff] %v856_v16  ;;  %v1275_v14 = vpop.eup %1274 }
 0x22f   :  { %v847_v25 = vsub.f32 1.0, %v1275_v14  ;;  %v855_v29 = vmul.f32 %v1275_v14, %v1517_v12 }
 0x230   :  { %v857_v20 = vadd.f32 %v853_v19, %v849_v18 }
 0x231   :  { %v1277_v22 = vpop.eup %1276 }
 0x232   :  { %v860_v23 = vpack.c.bf16 %v857_v20, %v856_v16  ;;  %970 = vst [vmem:[%s1588_s11 + $0x8] sm:$0xff] %v857_v20  ;;  %v850_v51 = vmul.f32 %v1277_v22, %v846_v21 }
 0x234   :  { %1152 = vmatprep.mubr.bf16.mxu1 %v860_v23  ;;  %v858_v26 = vadd.f32 %v854_v24, %v850_v51 }
 0x235   :  { %v1279_v52 = vpop.eup %1278 }
 0x236   :  { %v851_v27 = vmul.f32 %v1279_v52, %v847_v25  ;;  %971 = vst [vmem:[%s1588_s11 + $0x10] sm:$0xff] %v858_v26 }
 0x238   :  { %v859_v30 = vadd.f32 %v855_v29, %v851_v27 }
 0x23a   :  { %v861_v32 = vpack.c.bf16 %v859_v30, %v858_v26  ;;  %972 = vst [vmem:[%s1588_s11 + $0x18] sm:$0xff] %v859_v30 }
 0x23c   :  { %1153 = vmatmul.mubr.bf16.vlgmr.msra.gmra.mxu1 %v861_v32 }
 0x2fc   :  { %v1154_v34 = vpop.f32.mrf.mxu1 }
 0x2fd   :  { %v959_v35 = vadd.f32 %v1154_v34, %v1045_v11 }
 0x2fe   :  { %v950_v36 = vpop.f32.mrf.mxu1 }
 0x2ff   :  { %967 = vst [vmem:[%s1587_s10 + $0x10] sm:$0xff] %v959_v35  ;;  %v951_v12 = vadd.f32 %v1045_v11, %v950_v36 }
 0x300   :  { %v1155_v37 = vpop.f32.mrf.mxu1 }
 0x301   :  { %965 = vst [vmem:[%s1587_s10] sm:$0xff] %v951_v12  ;;  %v962_v38 = vadd.f32 %v1155_v37, %v1045_v11 }
 0x302   :  { %v953_v39 = vpop.f32.mrf.mxu1 }
 0x303   :  { %968 = vst [vmem:[%s1587_s10 + $0x18] sm:$0xff] %v962_v38  ;;  %v954_v40 = vadd.f32 %v1045_v11, %v953_v39 }
 0x305   :  { %966 = vst [vmem:[%s1587_s10 + $0x8] sm:$0xff] %v954_v40 }
 0x306   :  { %981 = vsyncpa [#allocation3], 1 }
 0x307   :  { %982 = vsyncpa [#allocation5], 1 }
 0x308   :  { %983 = vsyncpa [#allocation8], 1 }

</bundles_post_ra>
